<compile_context>
chip_gen: v7x
topology: tpu7x:2x2x1
jax: 0.10.0
libtpu: 0.0.40
codegen_flags: <defaults>
</compile_context>

<pallas_src>
import jax
import jax.numpy as jnp
from jax.experimental import pallas as pl
from jax.experimental.pallas import tpu as pltpu


def _round_up(x, m):
    return (x + m - 1) // m * m


def _mlp_kernel(x_ref, w1_ref, b1_ref, w2_ref, b2_ref, w3_ref, b3_ref, o_ref):
    # x_ref: (TB, 128) bf16.  w1/w2 bf16, b1/b2/w3 f32 in VMEM, b3 scalar in SMEM.
    x = x_ref[...]

    # fc1 + relu : bf16 operands on the MXU, f32 accumulation, f32 elementwise.
    h1 = jnp.dot(x, w1_ref[...], preferred_element_type=jnp.float32) + b1_ref[...]
    h1 = jnp.maximum(h1, 0.0)

    # fc2 + relu : downcast only at the dot inputs, keep elementwise math in f32.
    h2 = jnp.dot(h1.astype(jnp.bfloat16), w2_ref[...],
                 preferred_element_type=jnp.float32) + b2_ref[...]
    h2 = jnp.maximum(h2, 0.0)

    # fc3 (32 -> 1): VPU multiply + XLU lane reduce — frees the MXU slot for an N=1 result.
    logits = jnp.sum(h2 * w3_ref[...], axis=-1, keepdims=True) + b3_ref[0, 0]

    # sigmoid: EUP exp + approximate reciprocal (keeps the tiny epilogue off the VALU).
    o_ref[...] = pl.reciprocal(1.0 + jnp.exp(-logits), approx=True)


def binary_classification_forward(x, params, *, block_batch=1024):
    """x: (B, 128) array (any float/int dtype). Returns (B, 1) float32 probabilities."""
    w1, b1, w2, b2, w3, b3 = params
    B, F = x.shape
    assert F == 128, f"expected 128 input features, got {F}"

    # x.float() in the PyTorch module, then bf16 for the DMA / first MXU operand
    # (halves HBM traffic for x — the dominant bytes); accumulation stays f32.
    x_bf16 = x.astype(jnp.float32).astype(jnp.bfloat16)
    w1_bf16 = w1.astype(jnp.bfloat16)
    w2_bf16 = w2.astype(jnp.bfloat16)
    b1_f32 = b1.astype(jnp.float32)
    b2_f32 = b2.astype(jnp.float32)
    w3_row = w3.astype(jnp.float32).reshape(1, -1)   # (1, 32) row for the VPU reduce
    b3_f32 = b3.astype(jnp.float32).reshape(1, 1)    # SMEM scalar

    # Batch tile: multiple of 8 sublanes, capped at block_batch (and at B rounded up).
    tb = min(_round_up(block_batch, 8), _round_up(B, 8))
    grid = (pl.cdiv(B, tb),)

    # Weights/biases: same block every grid step -> stay resident in VMEM.
    resident = lambda shape: pl.BlockSpec(shape, lambda i: (0,) * len(shape))

    flops = 2 * B * (128 * 64 + 64 * 32 + 32)
    bytes_accessed = (B * 128 * 2 + B * 4                      # x (bf16) + out (f32)
                      + (128 * 64 + 64 * 32) * 2               # bf16 weights
                      + (64 + 32 + 32 + 1) * 4)                # f32 biases + w3 row

    return pl.pallas_call(
        _mlp_kernel,
        out_shape=jax.ShapeDtypeStruct((B, 1), jnp.float32),
        grid_spec=pl.GridSpec(
            grid=grid,
            in_specs=[
                pl.BlockSpec((tb, 128), lambda i: (i, 0)),          # x: batch-tiled
                resident(w1_bf16.shape), resident(b1_f32.shape),
                resident(w2_bf16.shape), resident(b2_f32.shape),
                resident(w3_row.shape),
                pl.BlockSpec(memory_space=pltpu.MemorySpace.SMEM),  # b3 scalar
            ],
            out_specs=pl.BlockSpec((tb, 1), lambda i: (i, 0)),
        ),
        compiler_params=pltpu.CompilerParams(
            dimension_semantics=("parallel",)),                     # megacore on v7x, free elsewhere
        cost_estimate=pl.CostEstimate(
            flops=flops, transcendentals=2 * B, bytes_accessed=bytes_accessed),
    )(x_bf16, w1_bf16, b1_f32, w2_bf16, b2_f32, w3_row, b3_f32)


def init_params(key):
    """Deterministic init mimicking nn.Linear's U(-1/sqrt(fan_in), 1/sqrt(fan_in))."""
    def linear(key, fan_in, fan_out):
        kw, kb = jax.random.split(key)
        bound = 1.0 / jnp.sqrt(fan_in)
        w = jax.random.uniform(kw, (fan_in, fan_out), jnp.float32, -bound, bound)
        b = jax.random.uniform(kb, (1, fan_out), jnp.float32, -bound, bound)
        return w, b

    k1, k2, k3 = jax.random.split(key, 3)
    w1, b1 = linear(k1, 128, 64)
    w2, b2 = linear(k2, 64, 32)
    w3, b3 = linear(k3, 32, 1)
    return (w1, b1, w2, b2, w3, b3)


def _reference_forward(x, params):
    """Pure-f32 reference matching the PyTorch module exactly."""
    w1, b1, w2, b2, w3, b3 = params
    x = x.astype(jnp.float32)
    h1 = jnp.maximum(x @ w1 + b1, 0.0)
    h2 = jnp.maximum(h1 @ w2 + b2, 0.0)
    return jax.nn.sigmoid(h2 @ w3 + b3)


if __name__ == "__main__":
    key = jax.random.PRNGKey(0)
    k_params, k_x = jax.random.split(key)

    params = init_params(k_params)
    B = 24
    x = jax.random.normal(k_x, (B, 128), dtype=jnp.float32)

    # Multi-step batch grid (TB=8 -> grid=(3,)) to exercise the tiled index_maps.
    out_tiled = jax.block_until_ready(
        binary_classification_forward(x, params, block_batch=8))
    # Default (single-tile at this small B) path.
    out_default = jax.block_until_ready(
        binary_classification_forward(x, params))

    ref = _reference_forward(x, params)

    assert out_tiled.shape == (B, 1), out_tiled.shape
    assert out_default.shape == (B, 1), out_default.shape
    assert not jnp.any(jnp.isnan(out_tiled))
    # bf16 matmul operands (f32 accumulation) vs f32 reference: sigmoid outputs in [0,1],
    # expected deviation ~1e-3; 1e-2 absolute tolerance is comfortably safe.
    assert jnp.allclose(out_tiled, ref, atol=1e-2, rtol=1e-2), "tiled mismatch vs reference"
    assert jnp.allclose(out_default, ref, atol=1e-2, rtol=1e-2), "default mismatch vs reference"
    assert jnp.allclose(out_tiled, out_default, atol=1e-5, rtol=1e-5), "tiling changed result"

    print("KERNEL_OK")
</pallas_src>

<mosaic_0001>
module attributes {stable_mosaic.version = 11 : i64} {
  func.func @_mlp_kernel(%arg0: i32, %arg1: memref<8x128xbf16, #tpu.memory_space<vmem>>, %arg2: memref<128x64xbf16, #tpu.memory_space<vmem>>, %arg3: memref<1x64xf32, #tpu.memory_space<vmem>>, %arg4: memref<64x32xbf16, #tpu.memory_space<vmem>>, %arg5: memref<1x32xf32, #tpu.memory_space<vmem>>, %arg6: memref<1x32xf32, #tpu.memory_space<vmem>>, %arg7: memref<1x1xf32, #tpu.memory_space<smem>>, %arg8: memref<8x1xf32, #tpu.memory_space<vmem>>) attributes {dimension_semantics = [#tpu.dimension_semantics<parallel>], iteration_bounds = array<i64: 3>, scalar_prefetch = 0 : i64, scratch_operands = 0 : i64, tpu.core_type = #tpu.core_type<tc>, window_params = [{transform_indices = @transform_0, window_bounds = array<i64: 8, 128>}, {pipeline_mode = #tpu.pipeline_mode<synchronous>, transform_indices = @transform_1, window_bounds = array<i64: 128, 64>}, {pipeline_mode = #tpu.pipeline_mode<synchronous>, transform_indices = @transform_2, window_bounds = array<i64: 1, 64>}, {pipeline_mode = #tpu.pipeline_mode<synchronous>, transform_indices = @transform_3, window_bounds = array<i64: 64, 32>}, {pipeline_mode = #tpu.pipeline_mode<synchronous>, transform_indices = @transform_4, window_bounds = array<i64: 1, 32>}, {pipeline_mode = #tpu.pipeline_mode<synchronous>, transform_indices = @transform_5, window_bounds = array<i64: 1, 32>}, {transform_indices = @transform_6, window_bounds = array<i64: 1, 1>}, {transform_indices = @transform_7, window_bounds = array<i64: 8, 1>}]} {
    %c0 = arith.constant 0 : index
    %c0_0 = arith.constant 0 : index
    %0 = vector.load %arg1[%c0, %c0_0] : memref<8x128xbf16, #tpu.memory_space<vmem>>, vector<8x128xbf16>
    %c0_1 = arith.constant 0 : index
    %c0_2 = arith.constant 0 : index
    %1 = vector.load %arg2[%c0_1, %c0_2] : memref<128x64xbf16, #tpu.memory_space<vmem>>, vector<128x64xbf16>
    %cst = arith.constant dense<0.000000e+00> : vector<8x64xf32>
    %2 = tpu.matmul %0, %1, %cst {dimension_numbers = #tpu.dot_dimension_numbers<[1], [0], [0], [1], [0, 0, 1, 1], [], []>} : vector<8x128xbf16>, vector<128x64xbf16>, vector<8x64xf32> -> vector<8x64xf32>
    %c0_3 = arith.constant 0 : index
    %c0_4 = arith.constant 0 : index
    %3 = vector.load %arg3[%c0_3, %c0_4] : memref<1x64xf32, #tpu.memory_space<vmem>>, vector<1x64xf32>
    %4 = vector.broadcast %3 : vector<1x64xf32> to vector<8x64xf32>
    %5 = arith.addf %2, %4 : vector<8x64xf32>
    %cst_5 = arith.constant 0.000000e+00 : f32
    %6 = vector.broadcast %cst_5 : f32 to vector<8x64xf32>
    %7 = arith.maximumf %5, %6 : vector<8x64xf32>
    %8 = arith.truncf %7 : vector<8x64xf32> to vector<8x64xbf16>
    %c0_6 = arith.constant 0 : index
    %c0_7 = arith.constant 0 : index
    %9 = vector.load %arg4[%c0_6, %c0_7] : memref<64x32xbf16, #tpu.memory_space<vmem>>, vector<64x32xbf16>
    %cst_8 = arith.constant dense<0.000000e+00> : vector<8x32xf32>
    %10 = tpu.matmul %8, %9, %cst_8 {dimension_numbers = #tpu.dot_dimension_numbers<[1], [0], [0], [1], [0, 0, 1, 1], [], []>} : vector<8x64xbf16>, vector<64x32xbf16>, vector<8x32xf32> -> vector<8x32xf32>
    %c0_9 = arith.constant 0 : index
    %c0_10 = arith.constant 0 : index
    %11 = vector.load %arg5[%c0_9, %c0_10] : memref<1x32xf32, #tpu.memory_space<vmem>>, vector<1x32xf32>
    %12 = vector.broadcast %11 : vector<1x32xf32> to vector<8x32xf32>
    %13 = arith.addf %10, %12 : vector<8x32xf32>
    %cst_11 = arith.constant 0.000000e+00 : f32
    %14 = vector.broadcast %cst_11 : f32 to vector<8x32xf32>
    %15 = arith.maximumf %13, %14 : vector<8x32xf32>
    %c0_12 = arith.constant 0 : index
    %c0_13 = arith.constant 0 : index
    %16 = vector.load %arg6[%c0_12, %c0_13] : memref<1x32xf32, #tpu.memory_space<vmem>>, vector<1x32xf32>
    %17 = vector.broadcast %16 : vector<1x32xf32> to vector<8x32xf32>
    %18 = arith.mulf %15, %17 : vector<8x32xf32>
    %cst_14 = arith.constant dense<0.000000e+00> : vector<8xf32>
    %19 = vector.multi_reduction <add>, %18, %cst_14 [1] : vector<8x32xf32> to vector<8xf32>
    %20 = vector.shape_cast %19 : vector<8xf32> to vector<8x1xf32>
    %c0_15 = arith.constant 0 : index
    %c0_16 = arith.constant 0 : index
    %21 = memref.load %arg7[%c0_15, %c0_16] : memref<1x1xf32, #tpu.memory_space<smem>>
    %22 = vector.broadcast %21 : f32 to vector<8x1xf32>
    %23 = arith.addf %20, %22 : vector<8x1xf32>
    %cst_17 = arith.constant 0.000000e+00 : f32
    %24 = vector.broadcast %cst_17 : f32 to vector<8x1xf32>
    %25 = arith.subf %24, %23 : vector<8x1xf32>
    %26 = math.exp %25 : vector<8x1xf32>
    %cst_18 = arith.constant 1.000000e+00 : f32
    %27 = vector.broadcast %cst_18 : f32 to vector<8x1xf32>
    %28 = arith.addf %27, %26 : vector<8x1xf32>
    %29 = tpu.reciprocal %28 {approx = true} : vector<8x1xf32> -> vector<8x1xf32>
    %c0_19 = arith.constant 0 : index
    %c0_20 = arith.constant 0 : index
    %30 = vector.load %arg8[%c0_19, %c0_20] : memref<8x1xf32, #tpu.memory_space<vmem>>, vector<8x1xf32>
    tpu.vector_store %arg8[%c0_19, %c0_20], %29 {strides = array<i32>} : memref<8x1xf32, #tpu.memory_space<vmem>>, vector<8x1xf32>,
    return
  }
  func.func @transform_0(%arg0: i32) -> (i32, i32) {
    %c0_i32 = arith.constant 0 : i32
    %c0_i32_0 = arith.constant 0 : i32
    return %arg0, %c0_i32 : i32, i32
  }
  func.func @transform_1(%arg0: i32) -> (i32, i32) {
    %c0_i32 = arith.constant 0 : i32
    %c0_i32_0 = arith.constant 0 : i32
    %c0_i32_1 = arith.constant 0 : i32
    return %c0_i32, %c0_i32_0 : i32, i32
  }
  func.func @transform_2(%arg0: i32) -> (i32, i32) {
    %c0_i32 = arith.constant 0 : i32
    %c0_i32_0 = arith.constant 0 : i32
    %c0_i32_1 = arith.constant 0 : i32
    return %c0_i32, %c0_i32_0 : i32, i32
  }
  func.func @transform_3(%arg0: i32) -> (i32, i32) {
    %c0_i32 = arith.constant 0 : i32
    %c0_i32_0 = arith.constant 0 : i32
    %c0_i32_1 = arith.constant 0 : i32
    return %c0_i32, %c0_i32_0 : i32, i32
  }
  func.func @transform_4(%arg0: i32) -> (i32, i32) {
    %c0_i32 = arith.constant 0 : i32
    %c0_i32_0 = arith.constant 0 : i32
    %c0_i32_1 = arith.constant 0 : i32
    return %c0_i32, %c0_i32_0 : i32, i32
  }
  func.func @transform_5(%arg0: i32) -> (i32, i32) {
    %c0_i32 = arith.constant 0 : i32
    %c0_i32_0 = arith.constant 0 : i32
    %c0_i32_1 = arith.constant 0 : i32
    return %c0_i32, %c0_i32_0 : i32, i32
  }
  func.func @transform_6(%arg0: i32) -> (i32, i32) {
    %c0_i32 = arith.constant 0 : i32
    %c0_i32_0 = arith.constant 0 : i32
    %c0_i32_1 = arith.constant 0 : i32
    return %c0_i32, %c0_i32_0 : i32, i32
  }
  func.func @transform_7(%arg0: i32) -> (i32, i32) {
    %c0_i32 = arith.constant 0 : i32
    %c0_i32_0 = arith.constant 0 : i32
    return %arg0, %c0_i32 : i32, i32
  }
}

</mosaic_0001>

<bundles_post_ra>
// kernel: tpu_custom_call.1
= control target key start
LH: loop header
LB: loop body
LE: loop exit
PB: predicated region body
PF: predicated region fallthrough
CT: control target
= control target key end

     0   :  { %s699_s26 = smov 0   ;;  %s769_s0 = inlined_call_operand.vmem [shape: bf16[24,128], index: 0, kind: input, shape index: {}]   ;;  %s770_s1 = inlined_call_operand.vmem [shape: bf16[128,64], index: 1, kind: input, shape index: {}]   ;;  %s771_s2 = inlined_call_operand.vmem [shape: f32[1,64], index: 2, kind: input, shape index: {}]   ;;  %s772_s3 = inlined_call_operand.vmem [shape: bf16[64,32], index: 3, kind: input, shape index: {}]   ;;  %s773_s4 = inlined_call_operand.vmem [shape: f32[1,32], index: 4, kind: input, shape index: {}]   ;;  %s774_s5 = inlined_call_operand.vmem [shape: f32[1,32], index: 5, kind: input, shape index: {}]   ;;  %s775_s6 = inlined_call_operand.<no memory space> [shape: f32[1,1], index: 6, kind: input, shape index: {}]   ;;  %s776_s7 = inlined_call_operand.vmem [shape: f32[24,1], index: 7, kind: output, shape index: {}]  }
   0x1   :  { %12 = sst [smem:[#allocation2]] %s775_s6 }
   0x2 LB: > { %s549_s27 = sadd.s32 4294967295, %s652_s26   ;;  %p553_p0 = scmp.ge.s32.totalorder %s652_s26, 1  ;;  %s652_s26 = sphi %s699_s26, %s18_s26  }
   0x3   : > { %p237_p1 = scmp.lt.s32.totalorder %s652_s26, 4 }
   0x5   : > { %p238_p2 = pnand %p553_p0, %p237_p1 }
   0x6   : > { %v630_v0 = vld [vmem:[%s770_s1] sm:$0xff] (!%p238_p2)   ;;  %v654_v1 = vmov (!%p238_p2), 0.0   ;;  %v631_v2 = vld [vmem:[%s770_s1 + $0x8] sm:$0xff] (!%p238_p2)   ;;  %vm655_vm0 = vmmov (!%p238_p2), 0   ;;  %v632_v3 = vld [vmem:[%s770_s1 + $0x10] sm:$0xff] (!%p238_p2)   ;;  %p267_p3 = scmp.lt.s32.totalorder (!%p238_p2), %s549_s27, 2 }
   0x7   : > { %241 = sbr.rel (%p238_p2) target bundleno = 649 (0x289), region = 48  ;;  %588 = vmatprep.subr.bf16.mxu0 (!%p238_p2), %v654_v1  ;;  %608 = vmatprep.subr.bf16.mxu1 (!%p238_p2), %v654_v1  ;;  %v638_v4 = vld [vmem:[%s772_s3] sm:$0xff] (!%p238_p2)   ;;  %v633_v5 = vld [vmem:[%s770_s1 + $0x18] sm:$0xff] (!%p238_p2)   ;;  %v639_v6 = vld [vmem:[%s772_s3 + $0x8] sm:$0xff] (!%p238_p2)   ;;  %vm429_vm1 = vcmask (!%p238_p2), 523264   ;;  %vm482_vm2 = vcmask (!%p238_p2), 261120  }
   0x8   : > { %589 = vmatpush3.bf16.msra.mxu0 (!%p238_p2), %v630_v0  ;;  %604 = vmatprep.mubr.msk.bf16.mxu0 (!%p238_p2), %vm655_vm0, %v654_v1  ;;  %v634_v7 = vld [vmem:[%s770_s1 + $0x20] sm:$0xff] (!%p238_p2)   ;;  %v635_v8 = vld [vmem:[%s770_s1 + $0x28] sm:$0xff] (!%p238_p2)   ;;  %v636_v9 = vld [vmem:[%s770_s1 + $0x30] sm:$0xff] (!%p238_p2)   ;;  %s486_s16 = sld [smem:[#allocation2]] (!%p238_p2)  ;;  %vm494_vm3 = vcmask (!%p238_p2), 7168  }
   0x9   : > { %590 = vmatprep.subr.bf16.mxu0 (!%p238_p2), %v654_v1  ;;  %616 = vmatprep.mubr.msk.bf16.mxu1 (!%p238_p2), %vm655_vm0, %v654_v1  ;;  %v637_v10 = vld [vmem:[%s770_s1 + $0x38] sm:$0xff] (!%p238_p2)   ;;  %v640_v12 = vld [vmem:[%s772_s3 + $0x10] sm:$0xff] (!%p238_p2)   ;;  %v556_v14 = vld [vmem:[%s771_s2] ss:$0 sm:$0xff] (!%p238_p2) }
   0xa   : > { %609 = vmatpush3.bf16.msra.mxu1 (!%p238_p2), %v638_v4  ;;  %v641_v13 = vld [vmem:[%s772_s3 + $0x18] sm:$0xff] (!%p238_p2)   ;;  %v565_v22 = vld [vmem:[%s773_s4] ss:$0 sm:$0xff] (!%p238_p2) }
   0xb   : > { %610 = vmatprep.subr.bf16.mxu1 (!%p238_p2), %v654_v1  ;;  %v571_v27 = vld [vmem:[%s774_s5] ss:$0 sm:$0xff] (!%p238_p2) }
   0xc   : > { %591 = vmatpush3.bf16.msra.mxu0 (!%p238_p2), %v631_v2 }
   0xd   : > { %592 = vmatprep.subr.bf16.mxu0 (!%p238_p2), %v654_v1 }
   0xe   : > { %611 = vmatpush3.bf16.msra.mxu1 %v639_v6  ;;  %s778_s27 = smov (!%p267_p3, %s549_s27), 2  ;;  %v487_v32 = vstv %s486_s16 }
   0xf   : > { %612 = vmatprep.subr.bf16.mxu1 %v654_v1  ;;  %s554_s22 = sshll.u32 %s778_s27, 2  ;;  %s555_s17 = sshll.u32 %s778_s27, 3 }
  0x10   : > { %593 = vmatpush3.bf16.msra.mxu0 %v632_v3  ;;  %s270_s29 = scalar_lea.vmem %s769_s0, %s554_s22  ;;  %s274_s20 = scalar_lea.vmem %s776_s7, %s555_s17 }
  0x11   : > { %594 = vmatprep.subr.bf16.mxu0 %v654_v1  ;;  %v276_v11 = vld [vmem:[%s270_s29] sm:$0xf] }
  0x12   : > { %613 = vmatpush3.bf16.msra.mxu1 %v640_v12 }
  0x13   : > { %614 = vmatprep.subr.bf16.mxu1 %v654_v1 }
  0x14   : > { %595 = vmatpush3.bf16.msra.mxu0 %v633_v5 }
  0x15   : > { %596 = vmatprep.subr.bf16.mxu0 %v654_v1 }
  0x16   : > { %615 = vmatpush3.bf16.msra.mxu1 %v641_v13 }
  0x18   : > { %597 = vmatpush3.bf16.msra.mxu0 %v634_v7 }
  0x19   : > { %598 = vmatprep.subr.bf16.mxu0 %v654_v1 }
  0x1c   : > { %599 = vmatpush3.bf16.msra.mxu0 %v635_v8 }
  0x1d   : > { %600 = vmatprep.subr.bf16.mxu0 %v654_v1 }
  0x20   : > { %601 = vmatpush3.bf16.msra.mxu0 %v636_v9 }
  0x21   : > { %602 = vmatprep.subr.bf16.mxu0 %v654_v1 }
  0x24   : > { %603 = vmatpush3.bf16.msra.mxu0 %v637_v10 }
  0x27   : > { %605 = vmatmul.mubr.bf16.vlgmr.msra.gmra.mrb[0].mxu0 %v276_v11 }
  0xfa   : > { %v382_v15 = vpop.f32.mrb[0].mxu0 }
  0xfb   : > { %v383_v16 = vadd.f32 %v556_v14, %v382_v15  ;;  %v606_v17 = vpop.f32.mrb[1].mxu0 }
  0xfc   : > { %v385_v18 = vpop.f32.mrb[2].mxu0 }
  0xfd   : > { %v388_v19 = vmax.f32 %v383_v16, 0.0  ;;  %v607_v20 = vpop.f32.mrb[3].mxu0 }
  0xff   : > { %v389_v21 = vpack.c.bf16 %v388_v19, %v388_v19 }
 0x101   : > { %617 = vmatmul.mubr.msk.bf16.vlgmr.msra.gmra.mrb[0].mxu1 %vm429_vm1, %v389_v21 }
 0x1d4   : > { %v467_v23 = vpop.f32.mrb[0].mxu1 }
 0x1d5   : > { %v468_v24 = vadd.f32 %v565_v22, %v467_v23  ;;  %v618_v25 = vpop.f32.mrb[1].mxu1 }
 0x1d6   : > { %v470_v26 = vpop.f32.mrb[2].mxu1 }
 0x1d7   : > { %v473_v28 = vmax.f32 %v468_v24, 0.0  ;;  %v619_v29 = vpop.f32.mrb[3].mxu1 }
 0x1d9   : > { %v481_v30 = vmul.f32 %v571_v27, %v473_v28 }
 0x1db   : > { %v483_v31 = vsel %vm482_vm2, %v481_v30, 0.0 }
 0x1dc   : > { %484 = vadd.xlane.f32.xlu0 %v483_v31 }
 0x269   : > { %v485_v33 = vpop.xlane.xlu0 %484 }
 0x26a   : > { %v488_v34 = vadd.f32 %v487_v32, %v485_v33 }
 0x26c   : > { %v489_v35 = vsub.f32 0.0, %v488_v34 }
 0x26e   : > { %v490_v36 = vmul.f32 1.442695, %v489_v35 }
 0x270   : > { %642 = vpow2.f32 %v490_v36 }
 0x27a   : > { %v643_v37 = vpop.eup %642 }
 0x27b   : > { %v492_v38 = vadd.f32 1.0, %v643_v37 }
 0x27d   : > { %644 = vrcp.f32 %v492_v38 }
 0x287   : > { %v645_v39 = vpop.eup %644 }
 0x288   : > { %495 = vst.msk [vmem:[%s274_s20] sm:$0xff] %vm494_vm3, %v645_v39 }
 0x289 PF: > { %s18_s26 = sadd.s32 1, %s652_s26  }
 0x28a   : > { %p15_p4 = scmp.ge.s32.totalorder %s18_s26, 5  }
 0x28c   :  { %17 = sbr.rel (!%p15_p4) target bundleno = 2 (0x2), region = 78 }

</bundles_post_ra>
